<compile_context>
chip_gen: v7x
topology: tpu7x:2x2x1
jax: 0.10.0
libtpu: 0.0.40
codegen_flags: <defaults>
</compile_context>

<pallas_src>
import jax
import jax.numpy as jnp
from jax.experimental import pallas as pl
from jax.experimental.pallas import tpu as pltpu


def _pixel_attn_kernel(x_ref, w1t_ref, w2_ref, o_ref):
    # x_ref:   (C,  T)  pixel tile: channels in sublanes, pixels in lanes
    # w1t_ref: (Cr, C)  conv1 weight, pre-transposed (resident in VMEM)
    # w2_ref:  (Cr, 1)  conv2 weight (resident in VMEM)
    x = x_ref[...]

    # conv1 (1x1) as a channel matmul on the MXU, f32 accumulation; ReLU on VPU.
    h = jnp.dot(w1t_ref[...], x, preferred_element_type=jnp.float32)   # (Cr, T)
    h = jnp.maximum(h, 0.0)

    # conv2 (1x1) has output width 1: weighted sum over the Cr rows on the
    # VPU/XLU (avoids a serialized, tiny second MXU round-trip).
    a = jnp.sum(h * w2_ref[...].astype(jnp.float32), axis=0, keepdims=True)  # (1, T)
    a = jax.nn.sigmoid(a)

    # Broadcast multiply over channels (sublanes); keep elementwise in x's dtype
    # (no f32 upcast of the full tile on the store path).
    o_ref[...] = (x * a.astype(x.dtype)).astype(o_ref.dtype)


def _pick_pixel_tile(hw, c, itemsize, target_bytes=1 << 20, max_tile=8192):
    """Largest lane tile (multiple of 128) that divides H*W and keeps the
    (C, T) block around ~1 MiB. Falls back to a single full-width block when
    H*W is not a multiple of 128 (block == full dim is exempt from tiling rules)."""
    if hw % 128 != 0:
        # TODO(synk): very large, non-128-multiple H*W would make this single
        # block big; pad/mask the lane tail in that case.
        return hw
    cap = max(128, min(max_tile, target_bytes // max(1, c * itemsize)))
    cap -= cap % 128
    t = min(cap, hw)
    while hw % t != 0:
        t -= 128
    return t


def pixel_attention_layer(x_nchw, w1, w2):
    """x_nchw: (N, C, H, W). w1: (C, C//r). w2: (C//r, 1). Returns (N, C, H, W)."""
    N, C, H, W = x_nchw.shape
    Cr = w1.shape[1]
    assert w1.shape == (C, Cr) and w2.shape == (Cr, 1)
    if N > 1:
        # Block first dim is C (< full N*C), so it must obey sublane tiling.
        assert C % 8 == 0, "channels must be a multiple of 8 when batch > 1"

    HW = H * W
    T = _pick_pixel_tile(HW, C, x_nchw.dtype.itemsize)
    grid = (N, HW // T)

    # Free views: NCHW -> (N*C, H*W) is a contiguous collapse (no data movement).
    x2 = x_nchw.reshape(N * C, HW)
    w1t = jnp.transpose(w1)  # (Cr, C): tiny one-time transpose outside the kernel

    out2 = pl.pallas_call(
        _pixel_attn_kernel,
        out_shape=jax.ShapeDtypeStruct((N * C, HW), x_nchw.dtype),
        grid_spec=pltpu.PrefetchScalarGridSpec(
            num_scalar_prefetch=0,
            grid=grid,
            in_specs=[
                pl.BlockSpec((C, T), lambda n, j: (n, j)),   # pixel tile (lane-dense)
                pl.BlockSpec((Cr, C), lambda n, j: (0, 0)),  # w1^T (resident)
                pl.BlockSpec((Cr, 1), lambda n, j: (0, 0)),  # w2   (resident)
            ],
            out_specs=pl.BlockSpec((C, T), lambda n, j: (n, j)),
        ),
        compiler_params=pltpu.CompilerParams(
            dimension_semantics=("parallel", "parallel"),
            vmem_limit_bytes=32 * 1024 * 1024,
        ),
        # NOTE: when the caller can donate x, add input_output_aliases={0: 0}
        # to write in place and drop the second full-size HBM buffer.
    )(x2, w1t, w2)

    return out2.reshape(N, C, H, W)


def _reference(x_nchw, w1, w2):
    # Pure-JAX reference of the PyTorch forward (1x1 convs as einsums).
    h = jnp.einsum("nchw,cd->ndhw", x_nchw.astype(jnp.float32),
                   w1.astype(jnp.float32))
    h = jnp.maximum(h, 0.0)
    a = jnp.einsum("ndhw,do->nohw", h, w2.astype(jnp.float32))
    a = jax.nn.sigmoid(a)  # (N,1,H,W)
    return (x_nchw.astype(jnp.float32) * a).astype(x_nchw.dtype)


if __name__ == "__main__":
    # Small shapes consistent with the module: reduction=16 needs C >= 16.
    N, C, H, W = 2, 32, 16, 16
    reduction = 16
    Cr = C // reduction  # = 2

    key = jax.random.PRNGKey(0)
    kx, k1, k2 = jax.random.split(key, 3)

    x = jax.random.normal(kx, (N, C, H, W), dtype=jnp.float32)
    # nn.Conv2d 1x1, bias=False weights:
    #   conv1: (Cr, C, 1, 1) -> stored here as (C, Cr) for the channel matmul
    #   conv2: (1, Cr, 1, 1) -> stored here as (Cr, 1)
    w1 = jax.random.normal(k1, (C, Cr), dtype=jnp.float32) * 0.1
    w2 = jax.random.normal(k2, (Cr, 1), dtype=jnp.float32) * 0.1

    y = pixel_attention_layer(x, w1, w2)
    y = jax.block_until_ready(y)

    y_ref = _reference(x, w1, w2)
    assert y.shape == (N, C, H, W)
    assert jnp.allclose(y, y_ref, atol=1e-5, rtol=1e-5), "mismatch vs reference"

    print("KERNEL_OK")
</pallas_src>

<mosaic_0001>
module attributes {stable_mosaic.version = 11 : i64} {
  func.func @_pixel_attn_kernel(%arg0: i32, %arg1: i32, %arg2: memref<32x256xf32, #tpu.memory_space<vmem>>, %arg3: memref<2x32xf32, #tpu.memory_space<vmem>>, %arg4: memref<2x1xf32, #tpu.memory_space<vmem>>, %arg5: memref<32x256xf32, #tpu.memory_space<vmem>>) attributes {dimension_semantics = [#tpu.dimension_semantics<parallel>, #tpu.dimension_semantics<parallel>], iteration_bounds = array<i64: 2, 1>, scalar_prefetch = 0 : i64, scratch_operands = 0 : i64, tpu.core_type = #tpu.core_type<tc>, window_params = [{transform_indices = @transform_0, window_bounds = array<i64: 32, 256>}, {pipeline_mode = #tpu.pipeline_mode<synchronous>, transform_indices = @transform_1, window_bounds = array<i64: 2, 32>}, {pipeline_mode = #tpu.pipeline_mode<synchronous>, transform_indices = @transform_2, window_bounds = array<i64: 2, 1>}, {transform_indices = @transform_3, window_bounds = array<i64: 32, 256>}]} {
    %c0 = arith.constant 0 : index
    %c0_0 = arith.constant 0 : index
    %0 = vector.load %arg2[%c0, %c0_0] : memref<32x256xf32, #tpu.memory_space<vmem>>, vector<32x256xf32>
    %c0_1 = arith.constant 0 : index
    %c0_2 = arith.constant 0 : index
    %1 = vector.load %arg3[%c0_1, %c0_2] : memref<2x32xf32, #tpu.memory_space<vmem>>, vector<2x32xf32>
    %cst = arith.constant dense<0.000000e+00> : vector<2x256xf32>
    %2 = tpu.matmul %1, %0, %cst {dimension_numbers = #tpu.dot_dimension_numbers<[1], [0], [0], [1], [0, 0, 1, 1], [], []>} : vector<2x32xf32>, vector<32x256xf32>, vector<2x256xf32> -> vector<2x256xf32>
    %cst_3 = arith.constant 0.000000e+00 : f32
    %3 = vector.broadcast %cst_3 : f32 to vector<2x256xf32>
    %4 = arith.maximumf %2, %3 : vector<2x256xf32>
    %c0_4 = arith.constant 0 : index
    %c0_5 = arith.constant 0 : index
    %5 = vector.load %arg4[%c0_4, %c0_5] : memref<2x1xf32, #tpu.memory_space<vmem>>, vector<2x1xf32>
    %6 = vector.broadcast %5 : vector<2x1xf32> to vector<2x256xf32>
    %7 = arith.mulf %4, %6 : vector<2x256xf32>
    %cst_6 = arith.constant dense<0.000000e+00> : vector<256xf32>
    %8 = vector.multi_reduction <add>, %7, %cst_6 [0] : vector<2x256xf32> to vector<256xf32>
    %9 = vector.shape_cast %8 : vector<256xf32> to vector<1x256xf32>
    %10 = arith.negf %9 : vector<1x256xf32>
    %11 = math.exp %10 : vector<1x256xf32>
    %cst_7 = arith.constant 1.000000e+00 : f32
    %12 = vector.broadcast %cst_7 : f32 to vector<1x256xf32>
    %13 = arith.addf %12, %11 : vector<1x256xf32>
    %14 = arith.divf %12, %13 : vector<1x256xf32>
    %15 = vector.broadcast %14 : vector<1x256xf32> to vector<32x256xf32>
    %16 = arith.mulf %0, %15 : vector<32x256xf32>
    %c0_8 = arith.constant 0 : index
    %c0_9 = arith.constant 0 : index
    %17 = vector.load %arg5[%c0_8, %c0_9] : memref<32x256xf32, #tpu.memory_space<vmem>>, vector<32x256xf32>
    tpu.vector_store %arg5[%c0_8, %c0_9], %16 {strides = array<i32>} : memref<32x256xf32, #tpu.memory_space<vmem>>, vector<32x256xf32>,
    return
  }
  func.func @transform_0(%arg0: i32, %arg1: i32) -> (i32, i32) {
    %c0_i32 = arith.constant 0 : i32
    return %arg0, %arg1 : i32, i32
  }
  func.func @transform_1(%arg0: i32, %arg1: i32) -> (i32, i32) {
    %c0_i32 = arith.constant 0 : i32
    %c0_i32_0 = arith.constant 0 : i32
    %c0_i32_1 = arith.constant 0 : i32
    return %c0_i32, %c0_i32_0 : i32, i32
  }
  func.func @transform_2(%arg0: i32, %arg1: i32) -> (i32, i32) {
    %c0_i32 = arith.constant 0 : i32
    %c0_i32_0 = arith.constant 0 : i32
    %c0_i32_1 = arith.constant 0 : i32
    return %c0_i32, %c0_i32_0 : i32, i32
  }
  func.func @transform_3(%arg0: i32, %arg1: i32) -> (i32, i32) {
    %c0_i32 = arith.constant 0 : i32
    return %arg0, %arg1 : i32, i32
  }
}

</mosaic_0001>

<bundles_post_ra>
// kernel: tpu_custom_call.1
= control target key start
LH: loop header
LB: loop body
LE: loop exit
PB: predicated region body
PF: predicated region fallthrough
CT: control target
= control target key end

     0   :  { %8 = vsyncpa [#allocation3], 0  ;;  %s897_s0 = inlined_call_operand.hbm [shape: f32[64,256], index: 0, kind: input, shape index: {}]   ;;  %s898_s1 = inlined_call_operand.vmem [shape: f32[2,32], index: 1, kind: input, shape index: {}]   ;;  %s899_s2 = inlined_call_operand.vmem [shape: f32[2,1], index: 2, kind: input, shape index: {}]   ;;  %s900_s3 = inlined_call_operand.hbm [shape: f32[64,256], index: 3, kind: output, shape index: {}]  }
   0x1   :  { %10 = vsyncpa [#allocation3 + $0x1], 0 }
   0x2   :  { %11 = vsyncpa [#allocation4], 0 }
   0x3   :  { %13 = vsyncpa [#allocation4 + $0x1], 0  ;;  %s704_s12 = smov 0   ;;  %s706_s13 = smov 0  }
   0x4   :  { %s708_s14 = smov 0   ;;  %s710_s15 = smov 0  }
   0x5   :  { %s712_s16 = smov 0   ;;  %s714_s17 = smov 0  }
   0x6 LB: > { %s453_s18 = sadd.s32 4294967295, %s674_s17   ;;  %s454_s19 = sadd.s32 4294967294, %s674_s17   ;;  %s674_s17 = sphi %s714_s17, %s19_s17   ;;  %s670_s16 = sphi %s712_s16, %s915_s16   ;;  %s666_s15 = sphi %s710_s15, %s914_s15   ;;  %s662_s14 = sphi %s708_s14, %s913_s14   ;;  %s658_s13 = sphi %s706_s13, %s912_s13   ;;  %s654_s12 = sphi %s704_s12, %s911_s12  }
   0x7   : > { %s31_s20 = sadd.s32 1, %s670_s16  ;;  %s40_s21 = sadd.s32 1, %s662_s14 }
   0x8   : > { %p33_p0 = scmp.ge.s32.totalorder %s31_s20, 2  ;;  %p47_p1 = scmp.ne.s32.totalorder %s662_s14, %s658_s13 }
   0x9   : > { %p48_p2 = scmp.eq.s32.totalorder %s674_s17, 0  ;;  %p53_p3 = scmp.ne.s32.totalorder %s658_s13, %s654_s12 }
   0xa   : > { %s917_s20 = smov (%p33_p0, %s31_s20), 0  ;;  %p54_p5 = scmp.eq.s32.totalorder %s453_s18, 0 }
   0xb   : > { %p745_p4 = por %p48_p2, %p47_p1  ;;  %s35_s23 = ssub.s32 %s670_s16, %s917_s20 }
   0xc   : > { %p121_p6 = scmp.eq.s32.totalorder %s453_s18, 1  ;;  %p38_p7 = scmp.eq.s32.totalorder %s35_s23, 0 }
   0xd   : > { %p751_p8 = por %p54_p5, %p53_p3  ;;  %p127_p10 = scmp.eq.s32.totalorder %s454_s19, 1 }
   0xe   : > { %p755_p9 = por %p121_p6, %p47_p1  ;;  %p497_p13 = scmp.lt.s32.totalorder %s674_s17, 2 }
   0xf   : > { %s760_s26 = scalar_select %p38_p7, %s662_s14, %s40_s21  }
  0x10   : > { %s904_s25 = scalar_select %p755_p9, 1, 0 }
  0x11   : > { %p762_p11 = por %p127_p10, %p53_p3  ;;  %s153_s28 = sand.u32 1, %s662_s14  }
  0x12   : > { %s457_s29 = sshll.u32 %s153_s28, 6  ;;  %s474_s30 = sshll.u32 %s670_s16, 10 }
  0x13   : > { %s905_s27 = scalar_select %p762_p11, 1, 0 }
  0x14   : > { %s773_s6 = scalar_lea.hbm %s897_s0, %s474_s30  ;;  %s157_s7 = scalar_lea.vmem [#allocation2], %s457_s29 }
  0x15   : > { %s167_s8 = sshll.u32 %s157_s7, 4  ;;  %p779_p0 = pnand %p497_p13, %p745_p4  ;;  %s775_s8 = int_to_ptr.vmem [resolvable:$true] %s167_s8 }
  0x16   : > { %s784_s10 = scalar_lea.sflag [#allocation3], %s153_s28  ;;  %s562_s11 = scalar_lea.hbm %s773_s6, 1024 }
  0x17   : > { %p563_p2 = scmp.ne.s32.totalorder %s773_s6, %s562_s11  ;;  %p564_p3 = pneg %p779_p0 }
  0x18   : > { %s567_s21 = scalar_lea.hbm %s897_s0, 2048  ;;  %p568_p4 = scmp.lt.u32.totalorder %s773_s6, %s897_s0 }
  0x19   : > { %p565_p5 = pnand %p564_p3, %p563_p2  ;;  %p569_p7 = scmp.lt.u32.totalorder %s567_s21, %s562_s11 }
  0x1a   : > { %p571_p13 = scmp.lt.u32.totalorder %s562_s11, %s773_s6 }
  0x1b   : > { %p566_p6 = pneg %p565_p5  ;;  %p570_p10 = por %p569_p7, %p568_p4 }
  0x1d   : > { %p572_p12 = por %p571_p13, %p570_p10 }
  0x1f   : > { %p573_p1 = pnand %p572_p12, %p566_p6 }
  0x21   : > { %576 = shalt.err (!%p573_p1)
}
  0x22   : > { %s577_s28 = scalar_lea.vmem %s775_s8, 1024  ;;  %s676_s29 = smov [#allocation2]  }
  0x23   : > { %p578_p2 = scmp.ne.s32.totalorder %s775_s8, %s577_s28  ;;  %s582_s30 = sshll.u32 %s676_s29, 4  ;;  %s583_s30 = int_to_ptr.vmem [resolvable:$false] %s582_s30 }
  0x24   : > { %s584_s4 = scalar_lea.vmem %s583_s30, 2048  ;;  %p585_p9 = scmp.lt.s32.totalorder %s775_s8, %s583_s30 }
  0x25   : > { %p580_p5 = pnand %p578_p2, %p564_p3  ;;  %p586_p4 = scmp.lt.s32.totalorder %s584_s4, %s577_s28 }
  0x27   : > { %p581_p11 = pneg %p580_p5  ;;  %p587_p7 = por %p586_p4, %p585_p9 }
  0x29   : > { %p588_p10 = pnand %p587_p7, %p581_p11 }
  0x2b   : > { %591 = shalt.err (!%p588_p10)
}
  0x2c   : > { %s677_s5 = smov 256   ;;  %s678_s7 = smov 16  }
  0x2d   : > { %492 = dma.hbm_to_vmem [thread:$0]  (!%p779_p0), %s773_s6, 1024, %s775_s8, %s784_s10, %s677_s5, %s677_s5, %s678_s7  }
  0x2e   : > { %p175_p12 = scmp.lt.s32.totalorder %s674_s17, 3  ;;  %p907_p1 = scmp.ge.s32.totalorder %s674_s17, 1 }
  0x30   : > { %p176_p3 = pnand %p907_p1, %p175_p12 }
  0x31   : > { %s816_s11 = sand.u32 (!%p176_p3), 1, %s658_s13  }
  0x32   : > { %179 = sbr.rel (%p176_p3) target bundleno = 344 (0x158), region = 32  ;;  %s462_s18 = sshll.u32 (!%p176_p3), %s816_s11, 6 }
  0x33   : > { %s182_s19 = scalar_lea.sflag (!%p176_p3), [#allocation3], %s816_s11  ;;  %s185_s21 = scalar_lea.vmem (!%p176_p3), [#allocation2], %s462_s18 }
  0x39   : > { %645 = dma.done.wait (%p751_p8), %s182_s19, 1024  }
  0x3a   : > { %647 = vsyncadd (%p751_p8), %s182_s19, 4294966272  ;;  %v679_v0 = vmov 0.0   ;;  %v680_v1 = vmov 0   ;;  %v826_v2 = vld [vmem:[%s185_s21 + $0x8] sm:$0xff]  ;;  %v828_v3 = vld [vmem:[%s185_s21 + $0x18] sm:$0xff]  ;;  %vm221_vm0 = vcmask 261120  }
  0x3b   : > { %289 = vmatprep.mubr.f32.mxu0 %v679_v0  ;;  %553 = vset.pattern.permute.xlu0 %v680_v1  ;;  %v212_v4 = vld [vmem:[%s185_s21] sm:$0xff]  ;;  %v477_v5 = vpack.c.bf16 %v828_v3, %v826_v2  ;;  %v214_v6 = vld [vmem:[%s185_s21 + $0x10] sm:$0xff]  ;;  %v217_v7 = vld [vmem:[%s185_s21 + $0x28] sm:$0xff]  ;;  %vm306_vm1 = vcmask 1041408   ;;  %s476_s10 = sshll.u32 %s666_s15, 10  ;;  %s207_s22 = scalar_lea.vmem [#allocation5], %s462_s18 }
  0x3c   : > { %v219_v8 = vld [vmem:[%s185_s21 + $0x38] sm:$0xff]  ;;  %v479_v9 = vpack.c.bf16 %v214_v6, %v212_v4  ;;  %v216_v11 = vld [vmem:[%s185_s21 + $0x20] sm:$0xff]  ;;  %v218_v12 = vld [vmem:[%s185_s21 + $0x30] sm:$0xff]  ;;  %s366_s23 = sshll.u32 %s207_s22, 4  ;;  %s844_s30 = scalar_lea.hbm %s900_s3, %s476_s10  ;;  %s846_s23 = int_to_ptr.vmem [resolvable:$true] %s366_s23 }
  0x3d   : > { %v481_v10 = vpack.c.bf16 %v219_v8, %v217_v7  ;;  %478 = vmatprep.subr.bf16.mxu0 %v477_v5  ;;  %v298_v13 = vld [vmem:[%s899_s2] sm:$0x3]  ;;  %v483_v14 = vpack.c.bf16 %v218_v12, %v216_v11  ;;  %s350_s15 = scalar_lea.sflag [#allocation4], %s816_s11  ;;  %s592_s4 = scalar_lea.vmem %s846_s23, 1024 }
  0x3e   : > { %480 = vmatpush1.bf16.msra.mxu0 %v479_v9  ;;  %301 = vperm.xlu0 %553, %v298_v13   ;;  %v220_v15 = vld [vmem:[%s898_s1] sm:$0x3]  ;;  %p593_p8 = scmp.ne.s32.totalorder %s846_s23, %s592_s4  ;;  %p908_p9 = scmp.ne.s32.totalorder %s904_s25, 0 }
  0x3f   : > { %482 = vmatprep.subr.bf16.mxu0 %v481_v10  ;;  %s681_s5 = smov [#allocation5]  }
  0x40   : > { %p594_p11 = pnand %p593_p8, %p908_p9  ;;  %s596_s7 = sshll.u32 %s681_s5, 4  ;;  %s597_s7 = int_to_ptr.vmem [resolvable:$false] %s596_s7 }
  0x41   : > { %s598_s18 = scalar_lea.vmem %s597_s7, 2048  ;;  %p599_p6 = scmp.lt.s32.totalorder %s846_s23, %s597_s7 }
  0x42   : > { %484 = vmatpush1.bf16.msra.mxu0 %v483_v14  ;;  %p595_p0 = pneg %p594_p11  ;;  %p600_p13 = scmp.lt.s32.totalorder %s598_s18, %s592_s4 }
  0x44   : > { %p601_p2 = por %p600_p13, %p599_p6 }
  0x45   : > { %464 = vmatmul.mubr.msk.f32.vlgmr.msra.gmra.mrb[0].mxu0 %vm221_vm0, %v220_v15 }
  0x46   : > { %p602_p5 = pnand %p601_p2, %p595_p0 }
  0xbd   : > { %v302_v17 = vpop.permute.xlu0 %301 }
 0x118   : > { %v291_v16 = vpop.f32.mrb[0].mxu0 }
 0x119   : > { %v296_v18 = vmax.f32 %v291_v16, 0.0  ;;  %v293_v19 = vpop.f32.mrb[1].mxu0 }
 0x11a   : > { %v297_v20 = vmax.f32 %v293_v19, 0.0 }
 0x11b   : > { %v304_v21 = vmul.f32 %v302_v17, %v296_v18 }
 0x11c   : > { %v305_v22 = vmul.f32 %v302_v17, %v297_v20 }
 0x11d   : > { %v307_v23 = vsel %vm306_vm1, %v304_v21, 0.0 }
 0x11e   : > { %v308_v24 = vrot.slane %v307_v23, 4  ;;  %v314_v25 = vsel %vm306_vm1, %v305_v22, 0.0 }
 0x11f   : > { %v315_v26 = vrot.slane %v314_v25, 4 }
 0x120   : > { %v309_v27 = vadd.f32 %v308_v24, %v307_v23 }
 0x121   : > { %v316_v28 = vadd.f32 %v315_v26, %v314_v25 }
 0x122   : > { %v310_v29 = vrot.slane %v309_v27, 2 }
 0x123   : > { %v317_v30 = vrot.slane %v316_v28, 2 }
 0x124   : > { %v311_v31 = vadd.f32 %v310_v29, %v309_v27 }
 0x125   : > { %v318_v32 = vadd.f32 %v317_v30, %v316_v28 }
 0x126   : > { %v312_v33 = vrot.slane %v311_v31, 1 }
 0x127   : > { %v319_v34 = vrot.slane %v318_v32, 1 }
 0x128   : > { %v313_v35 = vadd.f32 %v312_v33, %v311_v31 }
 0x129   : > { %v320_v36 = vadd.f32 %v319_v34, %v318_v32 }
 0x12a   : > { %v465_v37 = vmul.f32 -1.442695, %v313_v35 }
 0x12b   : > { %v466_v38 = vmul.f32 -1.442695, %v320_v36 }
 0x12c   : > { %554 = vpow2.f32 %v465_v37 }
 0x12d   : > { %556 = vpow2.f32 %v466_v38 }
 0x136   : > { %v555_v39 = vpop.eup %554 }
 0x137   : > { %v557_v40 = vpop.eup %556  ;;  %v327_v41 = vadd.f32 1.0, %v555_v39 }
 0x138   : > { %v328_v42 = vadd.f32 1.0, %v557_v40 }
 0x139   : > { %558 = vrcp.f32 %v327_v41 }
 0x13a   : > { %560 = vrcp.f32 %v328_v42 }
 0x143   : > { %v559_v43 = vpop.eup %558 }
 0x144   : > { %v561_v44 = vpop.eup %560  ;;  %v333_v45 = vmul.f32 %v559_v43, %v212_v4  ;;  %v335_v46 = vmul.f32 %v559_v43, %v214_v6  ;;  %v337_v47 = vmul.f32 %v559_v43, %v216_v11  ;;  %v339_v48 = vmul.f32 %v559_v43, %v218_v12 }
 0x145   : > { %v334_v49 = vmul.f32 %v561_v44, %v826_v2  ;;  %v336_v50 = vmul.f32 %v561_v44, %v828_v3  ;;  %v338_v51 = vmul.f32 %v561_v44, %v217_v7  ;;  %v340_v52 = vmul.f32 %v561_v44, %v219_v8 }
 0x146   : > { %341 = vst [vmem:[%s207_s22] sm:$0xff] %v333_v45  ;;  %343 = vst [vmem:[%s207_s22 + $0x10] sm:$0xff] %v335_v46 }
 0x147   : > { %345 = vst [vmem:[%s207_s22 + $0x20] sm:$0xff] %v337_v47  ;;  %347 = vst [vmem:[%s207_s22 + $0x30] sm:$0xff] %v339_v48 }
 0x148   : > { %342 = vst [vmem:[%s207_s22 + $0x8] sm:$0xff] %v334_v49  ;;  %344 = vst [vmem:[%s207_s22 + $0x18] sm:$0xff] %v336_v50 }
 0x149   : > { %346 = vst [vmem:[%s207_s22 + $0x28] sm:$0xff] %v338_v51  ;;  %348 = vst [vmem:[%s207_s22 + $0x38] sm:$0xff] %v340_v52 }
 0x14a   : > { %605 = shalt.err (!%p602_p5)
}
 0x14b   : > { %s606_s19 = scalar_lea.hbm %s844_s30, 1024  ;;  %s610_s6 = scalar_lea.hbm %s900_s3, 2048 }
 0x14c   : > { %p607_p4 = scmp.ne.s32.totalorder %s844_s30, %s606_s19  ;;  %p611_p12 = scmp.lt.u32.totalorder %s844_s30, %s900_s3 }
 0x14d   : > { %p612_p1 = scmp.lt.u32.totalorder %s610_s6, %s606_s19  ;;  %p614_p8 = scmp.lt.u32.totalorder %s606_s19, %s844_s30 }
 0x14e   : > { %p608_p7 = pnand %p607_p4, %p908_p9 }
 0x14f   : > { %p613_p3 = por %p612_p1, %p611_p12 }
 0x150   : > { %p609_p10 = pneg %p608_p7 }
 0x151   : > { %p615_p11 = por %p614_p8, %p613_p3 }
 0x153   : > { %p616_p0 = pnand %p615_p11, %p609_p10 }
 0x155   : > { %619 = shalt.err (!%p616_p0)
}
 0x156   : > { %s682_s10 = smov 256   ;;  %s683_s22 = smov 16  }
 0x157   : > { %487 = dma.vmem_to_hbm [thread:$0]  (%p908_p9), %s846_s23, 1024, %s844_s30, %s350_s15, %s682_s10, %s682_s10, %s683_s22  }
 0x158 PF: > { %s381_s28 = sand.u32 1, %s654_s12   ;;  %p909_p6 = scmp.ne.s32.totalorder %s905_s27, 0 }
 0x159   : > { %p910_p13 = scmp.ge.s32.totalorder %s674_s17, 2  ;;  %s382_s29 = scalar_lea.sflag [#allocation4], %s381_s28 }
 0x15b   : > { %p494_p2 = pnand %p910_p13, %p909_p6 }
 0x15d   : > { %649 = dma.done.wait (!%p494_p2), %s382_s29, 1024  }
 0x15e   : > { %651 = vsyncadd (!%p494_p2), %s382_s29, 4294966272  ;;  %s19_s17 = sadd.s32 1, %s674_s17   ;;  %s911_s12 = smov %s658_s13 }
 0x15f   : > { %p16_p5 = scmp.ge.s32.totalorder %s19_s17, 4   ;;  %s912_s13 = smov %s662_s14 }
 0x160   : > { %s913_s14 = smov %s760_s26  ;;  %s914_s15 = smov %s670_s16 }
 0x161   : > { %s915_s16 = smov %s917_s20  ;;  %18 = sbr.rel (!%p16_p5) target bundleno = 6 (0x6), region = 77 }
 0x168   :  { %387 = vsyncpa [#allocation3], 1 }
 0x169   :  { %389 = vsyncpa [#allocation3 + $0x1], 1 }
 0x16a   :  { %390 = vsyncpa [#allocation4], 1 }
 0x16b   :  { %392 = vsyncpa [#allocation4 + $0x1], 1 }

</bundles_post_ra>
